<compile_context>
chip_gen: v7x
topology: tpu7x:2x2x1
jax: 0.10.0
libtpu: 0.0.40
codegen_flags: <defaults>
</compile_context>

<pallas_src>
import jax
import jax.numpy as jnp
from jax import lax
from jax.experimental import pallas as pl
from jax.experimental.pallas import tpu as pltpu


# ---------------------------------------------------------------------------
# Pass 1: fused K/V projection (1x1 convs == per-pixel channel matmuls).
# ---------------------------------------------------------------------------
def _kv_proj_kernel(x_ref, wkv_ref, bkv_ref, k_ref, v_ref):
    cd = wkv_ref.dtype
    two_c = k_ref.shape[-1]
    x = x_ref[0].astype(cd)                                       # (tn, C)
    kv = jnp.dot(x, wkv_ref[...], preferred_element_type=jnp.float32)
    kv = kv + bkv_ref[...]                                        # (tn, 3C) f32
    # TODO(synk): pad 2C/3C up to multiples of 128 so these column slices are
    # lane-aligned zero-copy views and the output stores are unmasked vst.
    k_ref[0] = kv[:, :two_c].astype(k_ref.dtype)
    v_ref[0] = kv[:, two_c:].astype(v_ref.dtype)


# ---------------------------------------------------------------------------
# Pass 2: flash-style non-local attention + residual.
# ---------------------------------------------------------------------------
def _non_local_flash_kernel(xq_ref, wq_ref, bq_ref, k_ref, v_ref,
                            o_ref, q_scr, m_scr, l_scr, acc_scr):
    ki = pl.program_id(2)
    cd = q_scr.dtype                  # MXU input dtype (bf16 default, f32 option)

    # --- per (b, q-tile) init: project Q once, reset online-softmax state ---
    @pl.when(ki == 0)
    def _():
        xq = xq_ref[0].astype(cd)                                 # (tq, C)
        q = jnp.dot(xq, wq_ref[...], preferred_element_type=jnp.float32)
        q_scr[...] = (q + bq_ref[...]).astype(cd)                 # cast once
        m_scr[...] = jnp.full_like(m_scr, -jnp.inf)
        l_scr[...] = jnp.zeros_like(l_scr)
        acc_scr[...] = jnp.zeros_like(acc_scr)

    k = k_ref[0]                                                  # (tk, 2C) cd
    v = v_ref[0]                                                  # (tk, C)  cd

    # Logits S = Q @ K^T: contract the last dims, no explicit transpose of K.
    s = lax.dot_general(q_scr[...], k,
                        dimension_numbers=(((1,), (1,)), ((), ())),
                        preferred_element_type=jnp.float32)       # (tq, tk) f32

    # --- online (streaming) softmax update ---
    m_prev = m_scr[...]                                           # (tq, 1)
    m_new = jnp.maximum(m_prev, jnp.max(s, axis=-1, keepdims=True))
    alpha = jnp.exp(m_prev - m_new)
    # TODO(synk): on v6e/v7x p can be computed with bf16 exp (bf16 EUP) to
    # roughly halve transcendental cost; kept f32 here for v5e portability.
    p = jnp.exp(s - m_new)                                        # (tq, tk) f32
    l_scr[...] = alpha * l_scr[...] + jnp.sum(p, axis=-1, keepdims=True)
    acc_scr[...] = alpha * acc_scr[...] + jnp.dot(
        p.astype(cd), v, preferred_element_type=jnp.float32)
    m_scr[...] = m_new

    # --- finalize: normalize, add residual, write the output tile ---
    @pl.when(ki == pl.num_programs(2) - 1)
    def _():
        inv_l = 1.0 / l_scr[...]                 # exact; once per q-tile
        out = acc_scr[...] * inv_l + xq_ref[0].astype(jnp.float32)
        o_ref[0] = out.astype(o_ref.dtype)


def _pick_tile(n, preferred):
    """Largest tile <= preferred that divides n (falls back to n itself)."""
    for t in (preferred, 1024, 512, 256, 128, 64, 32, 16, 8):
        if t <= n and n % t == 0:
            return t
    # TODO(synk): masked partial-tile path for awkward N instead of one giant
    # tile (a single N-sized tile can blow VMEM on v7x).
    return n


def _vmem_capacity_bytes():
    try:
        info = pltpu.get_tpu_info()
        cap = int(getattr(info, "vmem_capacity_bytes", 0) or 0)
        if cap > 0:
            return cap
    except Exception:
        pass
    return 64 * 1024 * 1024           # conservative: v7x per-TensorCore VMEM


def non_local_forward(x_nchw, params, *, block_q=None, block_k=None,
                      compute_dtype=jnp.bfloat16):
    """x_nchw: (B, C, H, W).  params: dict of weights/biases (see init_params)."""
    B, C, H, W = x_nchw.shape
    N = H * W

    # NCHW -> (B, N, C) so the 1x1 convs become per-pixel channel matmuls.
    # TODO(synk): fold this layout change into the kernel DMA (consume (B,C,N)
    # tiles / pad C to 128) to avoid two full-activation HBM round trips and
    # masked lane stores when C < 128.
    x_bnc = jnp.transpose(x_nchw.reshape(B, C, N), (0, 2, 1))

    cap = _vmem_capacity_bytes()
    small_vmem = cap <= 64 * 1024 * 1024          # v7x-class parts
    tq_def, tk_def = (256, 512) if small_vmem else (512, 512)
    tq = _pick_tile(N, block_q if block_q is not None else tq_def)
    tk = _pick_tile(N, block_k if block_k is not None else tk_def)
    tn = _pick_tile(N, 512)                       # projection tile

    cd = compute_dtype
    cs = jnp.dtype(cd).itemsize
    f4 = 4

    wq = params["wq"].astype(cd)                                         # (C, 2C)
    bq = params["bq"].astype(jnp.float32)                                # (1, 2C)
    wkv = jnp.concatenate([params["wk"], params["wv"]], axis=1).astype(cd)  # (C, 3C)
    bkv = jnp.concatenate([params["bk"], params["bv"]], axis=1).astype(jnp.float32)

    # VMEM working-set estimates (double-buffered I/O + scratch + temporaries).
    est_attn = (2 * tq * C * f4                               # x_q / residual tiles
                + 2 * tk * 2 * C * cs + 2 * tk * C * cs       # K, V tiles
                + 2 * tq * C * f4                             # output tiles
                + 2 * (C * 2 * C * cs + 2 * C * f4)           # Wq, bq
                + tq * 2 * C * cs                             # q_scr
                + tq * C * f4 + 2 * tq * f4                   # acc, m, l
                + 3 * tq * tk * f4)                           # s / p temporaries
    est_proj = (2 * tn * C * f4
                + 2 * tn * 2 * C * cs + 2 * tn * C * cs
                + 2 * (C * 3 * C * cs + 3 * C * f4)
                + 2 * tn * 3 * C * f4)
    est = max(est_attn, est_proj)
    # ~85% of physical VMEM => ~109 MiB on v5e/v6e, ~54 MiB on v7x (headroom).
    vmem_limit = int(min(max(2 * est, 32 * 1024 * 1024), int(0.85 * cap)))

    proj_params = pltpu.CompilerParams(
        dimension_semantics=("parallel", "parallel"),
        vmem_limit_bytes=vmem_limit)
    attn_params = pltpu.CompilerParams(
        dimension_semantics=("parallel", "parallel", "arbitrary"),
        vmem_limit_bytes=vmem_limit)

    # ---- Pass 1: K/V projection (each input pixel read exactly once). ----
    k_bnc, v_bnc = pl.pallas_call(
        _kv_proj_kernel,
        out_shape=(jax.ShapeDtypeStruct((B, N, 2 * C), cd),
                   jax.ShapeDtypeStruct((B, N, C), cd)),
        grid_spec=pltpu.PrefetchScalarGridSpec(
            num_scalar_prefetch=0,
            grid=(B, N // tn),
            in_specs=[
                pl.BlockSpec((1, tn, C), lambda b, i: (b, i, 0)),       # x
                pl.BlockSpec(wkv.shape, lambda b, i: (0, 0)),           # [Wk|Wv]
                pl.BlockSpec(bkv.shape, lambda b, i: (0, 0)),           # [bk|bv]
            ],
            out_specs=[
                pl.BlockSpec((1, tn, 2 * C), lambda b, i: (b, i, 0)),   # K
                pl.BlockSpec((1, tn, C), lambda b, i: (b, i, 0)),       # V
            ],
        ),
        compiler_params=proj_params,
    )(x_bnc, wkv, bkv)

    # ---- Pass 2: flash attention + residual. ----
    grid = (B, N // tq, N // tk)
    # NOTE: Wq/bq index maps are constant; on v7x pipeline_mode=pl.Buffered(1)
    # on those specs would single-buffer them and save VMEM.
    out_bnc = pl.pallas_call(
        _non_local_flash_kernel,
        out_shape=jax.ShapeDtypeStruct((B, N, C), x_bnc.dtype),
        grid_spec=pltpu.PrefetchScalarGridSpec(
            num_scalar_prefetch=0,
            grid=grid,
            in_specs=[
                pl.BlockSpec((1, tq, C), lambda b, qi, ki: (b, qi, 0)),      # x (Q + residual)
                pl.BlockSpec(wq.shape, lambda b, qi, ki: (0, 0)),            # Wq
                pl.BlockSpec(bq.shape, lambda b, qi, ki: (0, 0)),            # bq
                pl.BlockSpec((1, tk, 2 * C), lambda b, qi, ki: (b, ki, 0)),  # K
                pl.BlockSpec((1, tk, C), lambda b, qi, ki: (b, ki, 0)),      # V
            ],
            out_specs=pl.BlockSpec((1, tq, C), lambda b, qi, ki: (b, qi, 0)),
            scratch_shapes=[
                pltpu.VMEM((tq, 2 * C), cd),            # Q tile (compute dtype)
                pltpu.VMEM((tq, 1), jnp.float32),       # running max m
                pltpu.VMEM((tq, 1), jnp.float32),       # running sum l
                pltpu.VMEM((tq, C), jnp.float32),       # output accumulator
            ],
        ),
        compiler_params=attn_params,
    )(x_bnc, wq, bq, k_bnc, v_bnc)

    # (B, N, C) -> NCHW
    return jnp.transpose(out_bnc, (0, 2, 1)).reshape(B, C, H, W)


def _reference_forward(x_nchw, params):
    """Pure-JAX reference (mirrors the PyTorch forward exactly)."""
    B, C, H, W = x_nchw.shape
    N = H * W
    x_flat = x_nchw.reshape(B, C, N)                     # (B, C, N)
    # 1x1 convs == channel matmuls. Weights stored as (C_in, C_out).
    q = jnp.einsum("bcn,co->bon", x_flat, params["wq"]) + params["bq"].T[None]
    k = jnp.einsum("bcn,co->bon", x_flat, params["wk"]) + params["bk"].T[None]
    v = jnp.einsum("bcn,co->bon", x_flat, params["wv"]) + params["bv"].T[None]
    attn = jax.nn.softmax(jnp.einsum("bon,bom->bnm", q, k), axis=-1)  # (B,N,N)
    out = jnp.einsum("bcn,bmn->bcm", v, attn)            # V @ A^T
    return out.reshape(B, C, H, W) + x_nchw


def init_params(key, C):
    ks = jax.random.split(key, 6)
    scale = 1.0 / jnp.sqrt(C)
    return {
        "wq": (jax.random.normal(ks[0], (C, 2 * C), jnp.float32) * scale),
        "bq": (jax.random.normal(ks[1], (1, 2 * C), jnp.float32) * 0.1),
        "wk": (jax.random.normal(ks[2], (C, 2 * C), jnp.float32) * scale),
        "bk": (jax.random.normal(ks[3], (1, 2 * C), jnp.float32) * 0.1),
        "wv": (jax.random.normal(ks[4], (C, C), jnp.float32) * scale),
        "bv": (jax.random.normal(ks[5], (1, C), jnp.float32) * 0.1),
    }


if __name__ == "__main__":
    key = jax.random.PRNGKey(0)
    k_x, k_p = jax.random.split(key)

    B, C, H, W = 2, 4, 16, 16
    x = jax.random.normal(k_x, (B, C, H, W), jnp.float32)
    params = init_params(k_p, C)

    ref = _reference_forward(x, params)

    # f32 MXU path (tighter check; exact divide in the epilogue).
    out_f32 = jax.block_until_ready(
        non_local_forward(x, params, compute_dtype=jnp.float32))
    assert out_f32.shape == (B, C, H, W)
    err_f32 = float(jnp.max(jnp.abs(out_f32 - ref)))
    assert jnp.allclose(out_f32, ref, atol=1e-2, rtol=1e-2), err_f32

    # Default path: bf16 MXU inputs with f32 accumulation (fast on v5e/v6e/v7x).
    out_bf16 = jax.block_until_ready(non_local_forward(x, params))
    assert out_bf16.shape == (B, C, H, W)
    err_bf16 = float(jnp.max(jnp.abs(out_bf16 - ref)))
    assert jnp.allclose(out_bf16, ref, atol=1.5e-1, rtol=1.5e-1), err_bf16

    print("KERNEL_OK")
</pallas_src>

<mosaic_0001>
module attributes {stable_mosaic.version = 11 : i64} {
  func.func @_kv_proj_kernel(%arg0: i32, %arg1: i32, %arg2: memref<1x256x4xf32, #tpu.memory_space<vmem>>, %arg3: memref<4x12xf32, #tpu.memory_space<vmem>>, %arg4: memref<1x12xf32, #tpu.memory_space<vmem>>, %arg5: memref<1x256x8xf32, #tpu.memory_space<vmem>>, %arg6: memref<1x256x4xf32, #tpu.memory_space<vmem>>) attributes {dimension_semantics = [#tpu.dimension_semantics<parallel>, #tpu.dimension_semantics<parallel>], iteration_bounds = array<i64: 2, 1>, scalar_prefetch = 0 : i64, scratch_operands = 0 : i64, tpu.core_type = #tpu.core_type<tc>, window_params = [{transform_indices = @transform_0, window_bounds = array<i64: 1, 256, 4>}, {pipeline_mode = #tpu.pipeline_mode<synchronous>, transform_indices = @transform_1, window_bounds = array<i64: 4, 12>}, {pipeline_mode = #tpu.pipeline_mode<synchronous>, transform_indices = @transform_2, window_bounds = array<i64: 1, 12>}, {transform_indices = @transform_3, window_bounds = array<i64: 1, 256, 8>}, {transform_indices = @transform_4, window_bounds = array<i64: 1, 256, 4>}]} {
    %c0 = arith.constant 0 : index
    %c0_0 = arith.constant 0 : index
    %c0_1 = arith.constant 0 : index
    %0 = vector.load %arg2[%c0, %c0_0, %c0_1] : memref<1x256x4xf32, #tpu.memory_space<vmem>>, vector<1x256x4xf32>
    %1 = vector.shape_cast %0 : vector<1x256x4xf32> to vector<256x4xf32>
    %c0_2 = arith.constant 0 : index
    %c0_3 = arith.constant 0 : index
    %2 = vector.load %arg3[%c0_2, %c0_3] : memref<4x12xf32, #tpu.memory_space<vmem>>, vector<4x12xf32>
    %cst = arith.constant dense<0.000000e+00> : vector<256x12xf32>
    %3 = tpu.matmul %1, %2, %cst {dimension_numbers = #tpu.dot_dimension_numbers<[1], [0], [0], [1], [0, 0, 1, 1], [], []>} : vector<256x4xf32>, vector<4x12xf32>, vector<256x12xf32> -> vector<256x12xf32>
    %c0_4 = arith.constant 0 : index
    %c0_5 = arith.constant 0 : index
    %4 = vector.load %arg4[%c0_4, %c0_5] : memref<1x12xf32, #tpu.memory_space<vmem>>, vector<1x12xf32>
    %5 = vector.broadcast %4 : vector<1x12xf32> to vector<256x12xf32>
    %6 = arith.addf %3, %5 : vector<256x12xf32>
    %7 = vector.extract_strided_slice %6 {offsets = [0, 0], sizes = [256, 8], strides = [1, 1]} : vector<256x12xf32> to vector<256x8xf32>
    %c0_6 = arith.constant 0 : index
    %c0_7 = arith.constant 0 : index
    %c0_8 = arith.constant 0 : index
    %8 = vector.load %arg5[%c0_6, %c0_7, %c0_8] : memref<1x256x8xf32, #tpu.memory_space<vmem>>, vector<1x256x8xf32>
    %9 = vector.shape_cast %8 : vector<1x256x8xf32> to vector<256x8xf32>
    %10 = vector.shape_cast %7 : vector<256x8xf32> to vector<1x256x8xf32>
    tpu.vector_store %arg5[%c0_6, %c0_7, %c0_8], %10 {strides = array<i32>} : memref<1x256x8xf32, #tpu.memory_space<vmem>>, vector<1x256x8xf32>,
    %11 = vector.extract_strided_slice %6 {offsets = [0, 8], sizes = [256, 4], strides = [1, 1]} : vector<256x12xf32> to vector<256x4xf32>
    %c0_9 = arith.constant 0 : index
    %c0_10 = arith.constant 0 : index
    %c0_11 = arith.constant 0 : index
    %12 = vector.load %arg6[%c0_9, %c0_10, %c0_11] : memref<1x256x4xf32, #tpu.memory_space<vmem>>, vector<1x256x4xf32>
    %13 = vector.shape_cast %12 : vector<1x256x4xf32> to vector<256x4xf32>
    %14 = vector.shape_cast %11 : vector<256x4xf32> to vector<1x256x4xf32>
    tpu.vector_store %arg6[%c0_9, %c0_10, %c0_11], %14 {strides = array<i32>} : memref<1x256x4xf32, #tpu.memory_space<vmem>>, vector<1x256x4xf32>,
    return
  }
  func.func @transform_0(%arg0: i32, %arg1: i32) -> (i32, i32, i32) {
    %c0_i32 = arith.constant 0 : i32
    %c0_i32_0 = arith.constant 0 : i32
    return %arg0, %arg1, %c0_i32 : i32, i32, i32
  }
  func.func @transform_1(%arg0: i32, %arg1: i32) -> (i32, i32) {
    %c0_i32 = arith.constant 0 : i32
    %c0_i32_0 = arith.constant 0 : i32
    %c0_i32_1 = arith.constant 0 : i32
    return %c0_i32, %c0_i32_0 : i32, i32
  }
  func.func @transform_2(%arg0: i32, %arg1: i32) -> (i32, i32) {
    %c0_i32 = arith.constant 0 : i32
    %c0_i32_0 = arith.constant 0 : i32
    %c0_i32_1 = arith.constant 0 : i32
    return %c0_i32, %c0_i32_0 : i32, i32
  }
  func.func @transform_3(%arg0: i32, %arg1: i32) -> (i32, i32, i32) {
    %c0_i32 = arith.constant 0 : i32
    %c0_i32_0 = arith.constant 0 : i32
    return %arg0, %arg1, %c0_i32 : i32, i32, i32
  }
  func.func @transform_4(%arg0: i32, %arg1: i32) -> (i32, i32, i32) {
    %c0_i32 = arith.constant 0 : i32
    %c0_i32_0 = arith.constant 0 : i32
    return %arg0, %arg1, %c0_i32 : i32, i32, i32
  }
}

</mosaic_0001>

<bundles_post_ra>
// kernel: tpu_custom_call.1
= control target key start
LH: loop header
LB: loop body
LE: loop exit
PB: predicated region body
PF: predicated region fallthrough
CT: control target
= control target key end

     0   :  { %s1167_s15 = smov 0   ;;  %s1169_s16 = smov 0   ;;  %s1478_s0 = inlined_call_operand.vmem [shape: f32[2,256,4], index: 0, kind: input, shape index: {}]   ;;  %s1479_s1 = inlined_call_operand.vmem [shape: f32[4,12], index: 1, kind: input, shape index: {}]   ;;  %s1480_s2 = inlined_call_operand.vmem [shape: f32[1,12], index: 2, kind: input, shape index: {}]   ;;  %s1481_s3 = inlined_call_operand.vmem [shape: f32[2,256,8], index: 3, kind: output, shape index: {0}]   ;;  %s1482_s4 = inlined_call_operand.vmem [shape: f32[2,256,4], index: 4, kind: output, shape index: {1}]  }
   0x1   :  { %s1171_s17 = smov 0  }
   0x2 LB: > { %s27_s18 = sadd.s32 1, %s1135_s16  ;;  %p961_p0 = scmp.ge.s32.totalorder %s1139_s17, 1  ;;  %s1139_s17 = sphi %s1171_s17, %s15_s17   ;;  %s1135_s16 = sphi %s1169_s16, %s1484_s16   ;;  %s1131_s15 = sphi %s1167_s15, %s1483_s15  }
   0x3   : > { %p29_p1 = scmp.ge.s32.totalorder %s27_s18, 2  ;;  %p188_p2 = scmp.lt.s32.totalorder %s1139_s17, 3 }
   0x5   : > { %s1486_s18 = smov (%p29_p1, %s27_s18), 0  ;;  %p189_p3 = pnand %p961_p0, %p188_p2 }
   0x6   : > { %v293_v0 = vld [vmem:[%s1479_s1] sm:$0xf] (!%p189_p3)  ;;  %vm398_vm0 = vcmask (!%p189_p3), 1043456   ;;  %p232_p4 = scmp.lt.s32.totalorder (!%p189_p3), %s1131_s15, 1  ;;  %vm301_vm1 = vcmask (!%p189_p3), 31744   ;;  %vm627_vm2 = vcmask (!%p189_p3), 64512  }
   0x7   : > { %192 = sbr.rel (%p189_p3) target bundleno = 410 (0x19a), region = 32  ;;  %1040 = vmatprep.subr.msk.mxu0 (!%p189_p3), %vm398_vm0, %v293_v0  ;;  %1090 = vmatprep.subr.msk.mxu1 (!%p189_p3), %vm398_vm0, %v293_v0  ;;  %v1263_v33 = vld [vmem:[%s1480_s2] ss:$0 sm:$0xff] (!%p189_p3)  ;;  %s1141_s30 = smov (!%p189_p3), 120  }
   0x8   : > { %1041 = vmatpush3.msk.msra.mxu0 (!%p189_p3), %vm398_vm0, %v293_v0  ;;  %1091 = vmatpush3.msk.msra.mxu1 (!%p189_p3), %vm398_vm0, %v293_v0 }
   0xe   : > { %s1488_s15 = smov (!%p232_p4, %s1131_s15), 1 }
   0xf   : > { %s1188_s21 = sshll.u32 %s1488_s15, 8 }
  0x10   : > { %s1194_s24 = scalar_lea.vmem %s1478_s0, %s1188_s21  ;;  %s1269_s29 = scalar_lea.vmem %s1481_s3, %s1188_s21 }
  0x11   : > { %v261_v1 = vld [vmem:[%s1194_s24] sm:$0xff]  ;;  %v262_v3 = vld [vmem:[%s1194_s24 + $0x8] sm:$0xff]  ;;  %v263_v5 = vld [vmem:[%s1194_s24 + $0x10] sm:$0xff]  ;;  %s1403_s7 = scalar_lea.vmem %s1482_s4, %s1188_s21 }
  0x12   : > { %v277_v2 = vld [vmem:[%s1194_s24 + $0x80] sm:$0xff]  ;;  %1042 = vmatprep.mubr.msk.f32.mxu0 %vm301_vm1, %v261_v1  ;;  %v278_v4 = vld [vmem:[%s1194_s24 + $0x88] sm:$0xff]  ;;  %v279_v6 = vld [vmem:[%s1194_s24 + $0x90] sm:$0xff] }
  0x13   : > { %1066 = vmatprep.mubr.msk.f32.mxu1 %vm301_vm1, %v277_v2  ;;  %1043 = vmatmul.mubr.msk.f32.vlgmr.msra.gmra.mrb[0].mxu0 %vm301_vm1, %v262_v3  ;;  %v264_v7 = vld [vmem:[%s1194_s24 + $0x18] sm:$0xff]  ;;  %v265_v9 = vld [vmem:[%s1194_s24 + $0x20] sm:$0xff]  ;;  %v266_v11 = vld [vmem:[%s1194_s24 + $0x28] sm:$0xff] }
  0x14   : > { %1067 = vmatmul.mubr.msk.f32.vlgmr.msra.gmra.mrb[0].mxu1 %vm301_vm1, %v278_v4  ;;  %1045 = vmatprep.mubr.msk.f32.mxu0 %vm301_vm1, %v263_v5  ;;  %v280_v8 = vld [vmem:[%s1194_s24 + $0x98] sm:$0xff]  ;;  %v281_v10 = vld [vmem:[%s1194_s24 + $0xa0] sm:$0xff]  ;;  %v282_v12 = vld [vmem:[%s1194_s24 + $0xa8] sm:$0xff] }
  0x15   : > { %1069 = vmatprep.mubr.msk.f32.mxu1 %vm301_vm1, %v279_v6  ;;  %v267_v13 = vld [vmem:[%s1194_s24 + $0x30] sm:$0xff]  ;;  %v268_v15 = vld [vmem:[%s1194_s24 + $0x38] sm:$0xff]  ;;  %v269_v17 = vld [vmem:[%s1194_s24 + $0x40] sm:$0xff] }
  0x16   : > { %v283_v14 = vld [vmem:[%s1194_s24 + $0xb0] sm:$0xff]  ;;  %v284_v16 = vld [vmem:[%s1194_s24 + $0xb8] sm:$0xff]  ;;  %v285_v18 = vld [vmem:[%s1194_s24 + $0xc0] sm:$0xff] }
  0x17   : > { %1046 = vmatmul.mubr.msk.f32.gmra.mrb[2].mxu0 %vm301_vm1, %v264_v7  ;;  %v270_v19 = vld [vmem:[%s1194_s24 + $0x48] sm:$0xff]  ;;  %v271_v21 = vld [vmem:[%s1194_s24 + $0x50] sm:$0xff]  ;;  %v272_v23 = vld [vmem:[%s1194_s24 + $0x58] sm:$0xff] }
  0x18   : > { %1070 = vmatmul.mubr.msk.f32.gmra.mrb[2].mxu1 %vm301_vm1, %v280_v8  ;;  %1048 = vmatprep.mubr.msk.f32.mxu0 %vm301_vm1, %v265_v9  ;;  %v286_v20 = vld [vmem:[%s1194_s24 + $0xc8] sm:$0xff]  ;;  %v287_v22 = vld [vmem:[%s1194_s24 + $0xd0] sm:$0xff]  ;;  %v288_v24 = vld [vmem:[%s1194_s24 + $0xd8] sm:$0xff] }
  0x19   : > { %1072 = vmatprep.mubr.msk.f32.mxu1 %vm301_vm1, %v281_v10  ;;  %v273_v25 = vld [vmem:[%s1194_s24 + $0x60] sm:$0xff]  ;;  %v274_v27 = vld [vmem:[%s1194_s24 + $0x68] sm:$0xff]  ;;  %v275_v29 = vld [vmem:[%s1194_s24 + $0x70] sm:$0xff] }
  0x1a   : > { %v289_v26 = vld [vmem:[%s1194_s24 + $0xe0] sm:$0xff]  ;;  %v290_v28 = vld [vmem:[%s1194_s24 + $0xe8] sm:$0xff]  ;;  %v291_v30 = vld [vmem:[%s1194_s24 + $0xf0] sm:$0xff] }
  0x1b   : > { %1049 = vmatmul.mubr.msk.f32.gmra.mrb[4].mxu0 %vm301_vm1, %v266_v11  ;;  %v276_v31 = vld [vmem:[%s1194_s24 + $0x78] sm:$0xff] }
  0x1c   : > { %1073 = vmatmul.mubr.msk.f32.gmra.mrb[4].mxu1 %vm301_vm1, %v282_v12  ;;  %1051 = vmatprep.mubr.msk.f32.mxu0 %vm301_vm1, %v267_v13  ;;  %v292_v32 = vld [vmem:[%s1194_s24 + $0xf8] sm:$0xff] }
  0x1d   : > { %1075 = vmatprep.mubr.msk.f32.mxu1 %vm301_vm1, %v283_v14 }
  0x1f   : > { %1052 = vmatmul.mubr.msk.f32.gmra.mrb[6].mxu0 %vm301_vm1, %v268_v15 }
  0x20   : > { %1076 = vmatmul.mubr.msk.f32.gmra.mrb[6].mxu1 %vm301_vm1, %v284_v16  ;;  %1054 = vmatprep.mubr.msk.f32.mxu0 %vm301_vm1, %v269_v17 }
  0x21   : > { %1078 = vmatprep.mubr.msk.f32.mxu1 %vm301_vm1, %v285_v18 }
  0x23   : > { %1055 = vmatmul.mubr.msk.f32.gmra.mrb[8].mxu0 %vm301_vm1, %v270_v19 }
  0x24   : > { %1079 = vmatmul.mubr.msk.f32.gmra.mrb[8].mxu1 %vm301_vm1, %v286_v20  ;;  %1057 = vmatprep.mubr.msk.f32.mxu0 %vm301_vm1, %v271_v21 }
  0x25   : > { %1081 = vmatprep.mubr.msk.f32.mxu1 %vm301_vm1, %v287_v22 }
  0x27   : > { %1058 = vmatmul.mubr.msk.f32.gmra.mrb[10].mxu0 %vm301_vm1, %v272_v23 }
  0x28   : > { %1082 = vmatmul.mubr.msk.f32.gmra.mrb[10].mxu1 %vm301_vm1, %v288_v24  ;;  %1060 = vmatprep.mubr.msk.f32.mxu0 %vm301_vm1, %v273_v25 }
  0x29   : > { %1084 = vmatprep.mubr.msk.f32.mxu1 %vm301_vm1, %v289_v26 }
  0x2b   : > { %1061 = vmatmul.mubr.msk.f32.gmra.mrb[12].mxu0 %vm301_vm1, %v274_v27 }
  0x2c   : > { %1085 = vmatmul.mubr.msk.f32.gmra.mrb[12].mxu1 %vm301_vm1, %v290_v28  ;;  %1063 = vmatprep.mubr.msk.f32.mxu0 %vm301_vm1, %v275_v29 }
  0x2d   : > { %1087 = vmatprep.mubr.msk.f32.mxu1 %vm301_vm1, %v291_v30 }
  0x2f   : > { %1064 = vmatmul.mubr.msk.f32.gmra.mrb[14].mxu0 %vm301_vm1, %v276_v31 }
  0x30   : > { %1088 = vmatmul.mubr.msk.f32.gmra.mrb[14].mxu1 %vm301_vm1, %v292_v32 }
  0xe6   : > { %v1044_v34 = vpop.f32.mrb[0].mxu0 }
  0xe7   : > { %v1068_v35 = vpop.f32.mrb[0].mxu1  ;;  %v474_v36 = vadd.f32 %v1044_v34, %v1263_v33  ;;  %v468_v38 = vpop.f32.mrb[1].mxu0 }
  0xe8   : > { %v554_v37 = vadd.f32 %v1068_v35, %v1263_v33  ;;  %v548_v39 = vpop.f32.mrb[1].mxu1  ;;  %v469_v40 = vadd.f32 %v1263_v33, %v468_v38 }
  0xe9   : > { %v549_v41 = vadd.f32 %v1263_v33, %v548_v39  ;;  %629 = vst.msk [vmem:[%s1269_s29 + $0x8] sm:$0xff] %vm627_vm2, %v474_v36  ;;  %694 = vrot.lane.b32.xlu0 %v474_v36, %s1141_s30 }
  0xea   : > { %645 = vst.msk [vmem:[%s1269_s29 + $0x88] sm:$0xff] %vm627_vm2, %v554_v37  ;;  %726 = vrot.lane.b32.xlu1 %v554_v37, %s1141_s30  ;;  %628 = vst.msk [vmem:[%s1269_s29] sm:$0xff] %vm627_vm2, %v469_v40  ;;  %v1047_v42 = vpop.f32.mrb[2].mxu0 }
  0xeb   : > { %644 = vst.msk [vmem:[%s1269_s29 + $0x80] sm:$0xff] %vm627_vm2, %v549_v41  ;;  %v1071_v43 = vpop.f32.mrb[2].mxu1  ;;  %v484_v44 = vadd.f32 %v1047_v42, %v1263_v33  ;;  %v478_v45 = vpop.f32.mrb[3].mxu0 }
  0xec   : > { %v564_v46 = vadd.f32 %v1071_v43, %v1263_v33  ;;  %v558_v47 = vpop.f32.mrb[3].mxu1  ;;  %v479_v48 = vadd.f32 %v1263_v33, %v478_v45 }
  0xed   : > { %v559_v49 = vadd.f32 %v1263_v33, %v558_v47  ;;  %631 = vst.msk [vmem:[%s1269_s29 + $0x18] sm:$0xff] %vm627_vm2, %v484_v44  ;;  %692 = vrot.lane.b32.xlu0 %v469_v40, %s1141_s30 }
  0xee   : > { %647 = vst.msk [vmem:[%s1269_s29 + $0x98] sm:$0xff] %vm627_vm2, %v564_v46  ;;  %698 = vrot.lane.b32.xlu1 %v484_v44, %s1141_s30  ;;  %630 = vst.msk [vmem:[%s1269_s29 + $0x10] sm:$0xff] %vm627_vm2, %v479_v48  ;;  %v1050_v50 = vpop.f32.mrb[4].mxu0 }
  0xef   : > { %646 = vst.msk [vmem:[%s1269_s29 + $0x90] sm:$0xff] %vm627_vm2, %v559_v49  ;;  %v1074_v51 = vpop.f32.mrb[4].mxu1  ;;  %v494_v52 = vadd.f32 %v1050_v50, %v1263_v33  ;;  %v488_v53 = vpop.f32.mrb[5].mxu0 }
  0xf0   : > { %v574_v54 = vadd.f32 %v1074_v51, %v1263_v33  ;;  %v568_v55 = vpop.f32.mrb[5].mxu1  ;;  %v489_v56 = vadd.f32 %v1263_v33, %v488_v53 }
  0xf1   : > { %v569_v57 = vadd.f32 %v1263_v33, %v568_v55  ;;  %724 = vrot.lane.b32.xlu0 %v549_v41, %s1141_s30  ;;  %633 = vst.msk [vmem:[%s1269_s29 + $0x28] sm:$0xff] %vm627_vm2, %v494_v52 }
  0xf2   : > { %730 = vrot.lane.b32.xlu1 %v564_v46, %s1141_s30  ;;  %649 = vst.msk [vmem:[%s1269_s29 + $0xa8] sm:$0xff] %vm627_vm2, %v574_v54  ;;  %632 = vst.msk [vmem:[%s1269_s29 + $0x20] sm:$0xff] %vm627_vm2, %v489_v56  ;;  %v1053_v58 = vpop.f32.mrb[6].mxu0 }
  0xf3   : > { %648 = vst.msk [vmem:[%s1269_s29 + $0xa0] sm:$0xff] %vm627_vm2, %v569_v57  ;;  %v1077_v59 = vpop.f32.mrb[6].mxu1  ;;  %v504_v60 = vadd.f32 %v1053_v58, %v1263_v33  ;;  %v498_v61 = vpop.f32.mrb[7].mxu0 }
  0xf4   : > { %v584_v62 = vadd.f32 %v1077_v59, %v1263_v33  ;;  %v578_v63 = vpop.f32.mrb[7].mxu1  ;;  %v499_v0 = vadd.f32 %v1263_v33, %v498_v61 }
  0xf5   : > { %v579_v1 = vadd.f32 %v1263_v33, %v578_v63  ;;  %728 = vrot.lane.b32.xlu0 %v559_v49, %s1141_s30  ;;  %635 = vst.msk [vmem:[%s1269_s29 + $0x38] sm:$0xff] %vm627_vm2, %v504_v60 }
  0xf6   : > { %696 = vrot.lane.b32.xlu1 %v479_v48, %s1141_s30  ;;  %651 = vst.msk [vmem:[%s1269_s29 + $0xb8] sm:$0xff] %vm627_vm2, %v584_v62  ;;  %634 = vst.msk [vmem:[%s1269_s29 + $0x30] sm:$0xff] %vm627_vm2, %v499_v0  ;;  %v1056_v2 = vpop.f32.mrb[8].mxu0 }
  0xf7   : > { %650 = vst.msk [vmem:[%s1269_s29 + $0xb0] sm:$0xff] %vm627_vm2, %v579_v1  ;;  %v1080_v3 = vpop.f32.mrb[8].mxu1  ;;  %v514_v4 = vadd.f32 %v1056_v2, %v1263_v33  ;;  %v508_v5 = vpop.f32.mrb[9].mxu0 }
  0xf8   : > { %v594_v6 = vadd.f32 %v1080_v3, %v1263_v33  ;;  %v588_v7 = vpop.f32.mrb[9].mxu1  ;;  %v509_v8 = vadd.f32 %v1263_v33, %v508_v5 }
  0xf9   : > { %v589_v9 = vadd.f32 %v1263_v33, %v588_v7  ;;  %700 = vrot.lane.b32.xlu0 %v489_v56, %s1141_s30  ;;  %637 = vst.msk [vmem:[%s1269_s29 + $0x48] sm:$0xff] %vm627_vm2, %v514_v4 }
  0xfa   : > { %702 = vrot.lane.b32.xlu1 %v494_v52, %s1141_s30  ;;  %653 = vst.msk [vmem:[%s1269_s29 + $0xc8] sm:$0xff] %vm627_vm2, %v594_v6  ;;  %636 = vst.msk [vmem:[%s1269_s29 + $0x40] sm:$0xff] %vm627_vm2, %v509_v8  ;;  %v1059_v10 = vpop.f32.mrb[10].mxu0 }
  0xfb   : > { %652 = vst.msk [vmem:[%s1269_s29 + $0xc0] sm:$0xff] %vm627_vm2, %v589_v9  ;;  %v1083_v11 = vpop.f32.mrb[10].mxu1  ;;  %v524_v12 = vadd.f32 %v1059_v10, %v1263_v33  ;;  %v518_v13 = vpop.f32.mrb[11].mxu0 }
  0xfc   : > { %v604_v14 = vadd.f32 %v1083_v11, %v1263_v33  ;;  %v598_v15 = vpop.f32.mrb[11].mxu1  ;;  %v519_v16 = vadd.f32 %v1263_v33, %v518_v13 }
  0xfd   : > { %v599_v17 = vadd.f32 %v1263_v33, %v598_v15  ;;  %732 = vrot.lane.b32.xlu0 %v569_v57, %s1141_s30  ;;  %639 = vst.msk [vmem:[%s1269_s29 + $0x58] sm:$0xff] %vm627_vm2, %v524_v12 }
  0xfe   : > { %734 = vrot.lane.b32.xlu1 %v574_v54, %s1141_s30  ;;  %655 = vst.msk [vmem:[%s1269_s29 + $0xd8] sm:$0xff] %vm627_vm2, %v604_v14  ;;  %638 = vst.msk [vmem:[%s1269_s29 + $0x50] sm:$0xff] %vm627_vm2, %v519_v16  ;;  %v1062_v18 = vpop.f32.mrb[12].mxu0 }
  0xff   : > { %654 = vst.msk [vmem:[%s1269_s29 + $0xd0] sm:$0xff] %vm627_vm2, %v599_v17  ;;  %v1086_v19 = vpop.f32.mrb[12].mxu1  ;;  %v534_v20 = vadd.f32 %v1062_v18, %v1263_v33  ;;  %v528_v21 = vpop.f32.mrb[13].mxu0 }
 0x100   : > { %v614_v22 = vadd.f32 %v1086_v19, %v1263_v33  ;;  %v608_v23 = vpop.f32.mrb[13].mxu1  ;;  %v529_v24 = vadd.f32 %v1263_v33, %v528_v21 }
 0x101   : > { %v609_v25 = vadd.f32 %v1263_v33, %v608_v23  ;;  %704 = vrot.lane.b32.xlu0 %v499_v0, %s1141_s30  ;;  %641 = vst.msk [vmem:[%s1269_s29 + $0x68] sm:$0xff] %vm627_vm2, %v534_v20 }
 0x102   : > { %706 = vrot.lane.b32.xlu1 %v504_v60, %s1141_s30  ;;  %657 = vst.msk [vmem:[%s1269_s29 + $0xe8] sm:$0xff] %vm627_vm2, %v614_v22  ;;  %640 = vst.msk [vmem:[%s1269_s29 + $0x60] sm:$0xff] %vm627_vm2, %v529_v24  ;;  %v1065_v26 = vpop.f32.mrb[14].mxu0 }
 0x103   : > { %656 = vst.msk [vmem:[%s1269_s29 + $0xe0] sm:$0xff] %vm627_vm2, %v609_v25  ;;  %v1089_v27 = vpop.f32.mrb[14].mxu1  ;;  %v544_v28 = vadd.f32 %v1065_v26, %v1263_v33  ;;  %v538_v29 = vpop.f32.mrb[15].mxu0 }
 0x104   : > { %v624_v30 = vadd.f32 %v1089_v27, %v1263_v33  ;;  %v618_v31 = vpop.f32.mrb[15].mxu1  ;;  %v539_v32 = vadd.f32 %v1263_v33, %v538_v29 }
 0x105   : > { %v619_v34 = vadd.f32 %v1263_v33, %v618_v31  ;;  %736 = vrot.lane.b32.xlu0 %v579_v1, %s1141_s30  ;;  %643 = vst.msk [vmem:[%s1269_s29 + $0x78] sm:$0xff] %vm627_vm2, %v544_v28 }
 0x106   : > { %738 = vrot.lane.b32.xlu1 %v584_v62, %s1141_s30  ;;  %659 = vst.msk [vmem:[%s1269_s29 + $0xf8] sm:$0xff] %vm627_vm2, %v624_v30  ;;  %642 = vst.msk [vmem:[%s1269_s29 + $0x70] sm:$0xff] %vm627_vm2, %v539_v32 }
 0x107   : > { %658 = vst.msk [vmem:[%s1269_s29 + $0xf0] sm:$0xff] %vm627_vm2, %v619_v34 }
 0x109   : > { %708 = vrot.lane.b32.xlu0 %v509_v8, %s1141_s30 }
 0x10a   : > { %710 = vrot.lane.b32.xlu1 %v514_v4, %s1141_s30 }
 0x10d   : > { %740 = vrot.lane.b32.xlu0 %v589_v9, %s1141_s30 }
 0x10e   : > { %742 = vrot.lane.b32.xlu1 %v594_v6, %s1141_s30 }
 0x111   : > { %712 = vrot.lane.b32.xlu0 %v519_v16, %s1141_s30 }
 0x112   : > { %714 = vrot.lane.b32.xlu1 %v524_v12, %s1141_s30 }
 0x115   : > { %744 = vrot.lane.b32.xlu0 %v599_v17, %s1141_s30 }
 0x116   : > { %746 = vrot.lane.b32.xlu1 %v604_v14, %s1141_s30 }
 0x119   : > { %716 = vrot.lane.b32.xlu0 %v529_v24, %s1141_s30 }
 0x11a   : > { %718 = vrot.lane.b32.xlu1 %v534_v20, %s1141_s30 }
 0x11d   : > { %748 = vrot.lane.b32.xlu0 %v609_v25, %s1141_s30 }
 0x11e   : > { %750 = vrot.lane.b32.xlu1 %v614_v22, %s1141_s30 }
 0x121   : > { %720 = vrot.lane.b32.xlu0 %v539_v32, %s1141_s30 }
 0x122   : > { %722 = vrot.lane.b32.xlu1 %v544_v28, %s1141_s30 }
 0x125   : > { %752 = vrot.lane.b32.xlu0 %v619_v34, %s1141_s30 }
 0x126   : > { %754 = vrot.lane.b32.xlu1 %v624_v30, %s1141_s30 }
 0x15b   : > { %v695_v35 = vpop.permute.xlu0 %694 }
 0x15c   : > { %v727_v33 = vpop.permute.xlu1 %726  ;;  %789 = vst.msk [vmem:[%s1403_s7 + $0x8] sm:$0xff] %vm301_vm1, %v695_v35 }
 0x15d   : > { %805 = vst.msk [vmem:[%s1403_s7 + $0x88] sm:$0xff] %vm301_vm1, %v727_v33 }
 0x15f   : > { %v693_v37 = vpop.permute.xlu0 %692 }
 0x160   : > { %v699_v36 = vpop.permute.xlu1 %698  ;;  %788 = vst.msk [vmem:[%s1403_s7] sm:$0xff] %vm301_vm1, %v693_v37 }
 0x161   : > { %791 = vst.msk [vmem:[%s1403_s7 + $0x18] sm:$0xff] %vm301_vm1, %v699_v36 }
 0x163   : > { %v725_v39 = vpop.permute.xlu0 %724 }
 0x164   : > { %v731_v38 = vpop.permute.xlu1 %730  ;;  %804 = vst.msk [vmem:[%s1403_s7 + $0x80] sm:$0xff] %vm301_vm1, %v725_v39 }
 0x165   : > { %807 = vst.msk [vmem:[%s1403_s7 + $0x98] sm:$0xff] %vm301_vm1, %v731_v38 }
 0x167   : > { %v729_v41 = vpop.permute.xlu0 %728 }
 0x168   : > { %v697_v40 = vpop.permute.xlu1 %696  ;;  %806 = vst.msk [vmem:[%s1403_s7 + $0x90] sm:$0xff] %vm301_vm1, %v729_v41 }
 0x169   : > { %790 = vst.msk [vmem:[%s1403_s7 + $0x10] sm:$0xff] %vm301_vm1, %v697_v40 }
 0x16b   : > { %v701_v43 = vpop.permute.xlu0 %700 }
 0x16c   : > { %v703_v42 = vpop.permute.xlu1 %702  ;;  %792 = vst.msk [vmem:[%s1403_s7 + $0x20] sm:$0xff] %vm301_vm1, %v701_v43 }
 0x16d   : > { %793 = vst.msk [vmem:[%s1403_s7 + $0x28] sm:$0xff] %vm301_vm1, %v703_v42 }
 0x16f   : > { %v733_v45 = vpop.permute.xlu0 %732 }
 0x170   : > { %v735_v44 = vpop.permute.xlu1 %734  ;;  %808 = vst.msk [vmem:[%s1403_s7 + $0xa0] sm:$0xff] %vm301_vm1, %v733_v45 }
 0x171   : > { %809 = vst.msk [vmem:[%s1403_s7 + $0xa8] sm:$0xff] %vm301_vm1, %v735_v44 }
 0x173   : > { %v705_v47 = vpop.permute.xlu0 %704 }
 0x174   : > { %v707_v46 = vpop.permute.xlu1 %706  ;;  %794 = vst.msk [vmem:[%s1403_s7 + $0x30] sm:$0xff] %vm301_vm1, %v705_v47 }
 0x175   : > { %795 = vst.msk [vmem:[%s1403_s7 + $0x38] sm:$0xff] %vm301_vm1, %v707_v46 }
 0x177   : > { %v737_v49 = vpop.permute.xlu0 %736 }
 0x178   : > { %v739_v48 = vpop.permute.xlu1 %738  ;;  %810 = vst.msk [vmem:[%s1403_s7 + $0xb0] sm:$0xff] %vm301_vm1, %v737_v49 }
 0x179   : > { %811 = vst.msk [vmem:[%s1403_s7 + $0xb8] sm:$0xff] %vm301_vm1, %v739_v48 }
 0x17b   : > { %v709_v51 = vpop.permute.xlu0 %708 }
 0x17c   : > { %v711_v50 = vpop.permute.xlu1 %710  ;;  %796 = vst.msk [vmem:[%s1403_s7 + $0x40] sm:$0xff] %vm301_vm1, %v709_v51 }
 0x17d   : > { %797 = vst.msk [vmem:[%s1403_s7 + $0x48] sm:$0xff] %vm301_vm1, %v711_v50 }
 0x17f   : > { %v741_v53 = vpop.permute.xlu0 %740 }
 0x180   : > { %v743_v52 = vpop.permute.xlu1 %742  ;;  %812 = vst.msk [vmem:[%s1403_s7 + $0xc0] sm:$0xff] %vm301_vm1, %v741_v53 }
 0x181   : > { %813 = vst.msk [vmem:[%s1403_s7 + $0xc8] sm:$0xff] %vm301_vm1, %v743_v52 }
 0x183   : > { %v713_v55 = vpop.permute.xlu0 %712 }
 0x184   : > { %v715_v54 = vpop.permute.xlu1 %714  ;;  %798 = vst.msk [vmem:[%s1403_s7 + $0x50] sm:$0xff] %vm301_vm1, %v713_v55 }
 0x185   : > { %799 = vst.msk [vmem:[%s1403_s7 + $0x58] sm:$0xff] %vm301_vm1, %v715_v54 }
 0x187   : > { %v745_v57 = vpop.permute.xlu0 %744 }
 0x188   : > { %v747_v56 = vpop.permute.xlu1 %746  ;;  %814 = vst.msk [vmem:[%s1403_s7 + $0xd0] sm:$0xff] %vm301_vm1, %v745_v57 }
 0x189   : > { %815 = vst.msk [vmem:[%s1403_s7 + $0xd8] sm:$0xff] %vm301_vm1, %v747_v56 }
 0x18b   : > { %v717_v59 = vpop.permute.xlu0 %716 }
 0x18c   : > { %v719_v58 = vpop.permute.xlu1 %718  ;;  %800 = vst.msk [vmem:[%s1403_s7 + $0x60] sm:$0xff] %vm301_vm1, %v717_v59 }
 0x18d   : > { %801 = vst.msk [vmem:[%s1403_s7 + $0x68] sm:$0xff] %vm301_vm1, %v719_v58 }
 0x18f   : > { %v749_v61 = vpop.permute.xlu0 %748 }
 0x190   : > { %v751_v60 = vpop.permute.xlu1 %750  ;;  %816 = vst.msk [vmem:[%s1403_s7 + $0xe0] sm:$0xff] %vm301_vm1, %v749_v61 }
 0x191   : > { %817 = vst.msk [vmem:[%s1403_s7 + $0xe8] sm:$0xff] %vm301_vm1, %v751_v60 }
 0x193   : > { %v721_v63 = vpop.permute.xlu0 %720 }
 0x194   : > { %v723_v62 = vpop.permute.xlu1 %722  ;;  %802 = vst.msk [vmem:[%s1403_s7 + $0x70] sm:$0xff] %vm301_vm1, %v721_v63 }
 0x195   : > { %803 = vst.msk [vmem:[%s1403_s7 + $0x78] sm:$0xff] %vm301_vm1, %v723_v62 }
 0x197   : > { %v753_v1 = vpop.permute.xlu0 %752 }
 0x198   : > { %v755_v0 = vpop.permute.xlu1 %754  ;;  %818 = vst.msk [vmem:[%s1403_s7 + $0xf0] sm:$0xff] %vm301_vm1, %v753_v1 }
 0x199   : > { %819 = vst.msk [vmem:[%s1403_s7 + $0xf8] sm:$0xff] %vm301_vm1, %v755_v0 }
 0x19a PF: > { %s15_s17 = sadd.s32 1, %s1139_s17   ;;  %s1483_s15 = smov %s1135_s16 }
 0x19b   : > { %p12_p5 = scmp.ge.s32.totalorder %s15_s17, 4   ;;  %s1484_s16 = smov %s1486_s18 }
 0x19d   :  { %14 = sbr.rel (!%p12_p5) target bundleno = 2 (0x2), region = 74 }

</bundles_post_ra>
